<compile_context>
chip_gen: v7x
topology: tpu7x:2x2x1
jax: 0.10.0
libtpu: 0.0.40
codegen_flags: <defaults>
</compile_context>

<pallas_src>
import functools
import math

import jax
import jax.numpy as jnp
from jax.experimental import pallas as pl
from jax.experimental.pallas import tpu as pltpu


# ----------------------------------------------------------------------------
# Tiled linear projection kernels
# ----------------------------------------------------------------------------
def _linear_kernel_acc(x_ref, w_ref, b_ref, o_ref, acc_ref):
    """Multi-k-step GEMM with f32 VMEM accumulator."""
    kk = pl.program_id(2)

    @pl.when(kk == 0)
    def _():
        acc_ref[...] = jnp.zeros(acc_ref.shape, dtype=acc_ref.dtype)

    acc_ref[...] += jnp.dot(
        x_ref[...], w_ref[...], preferred_element_type=jnp.float32
    )

    @pl.when(kk == pl.num_programs(2) - 1)
    def _():
        o_ref[...] = (acc_ref[...] + b_ref[...]).astype(o_ref.dtype)


def _linear_kernel_1k(x_ref, w_ref, b_ref, o_ref):
    """Fast path: the whole contraction fits in one k tile -> no scratch."""
    o_ref[...] = (
        jnp.dot(x_ref[...], w_ref[...], preferred_element_type=jnp.float32)
        + b_ref[...]
    ).astype(o_ref.dtype)


def _largest_divisor_tile(dim, preferred, align):
    """Largest multiple of `align` dividing `dim`, <= preferred; None if none."""
    t = (preferred // align) * align
    while t >= align:
        if dim % t == 0:
            return t
        t -= align
    return None


def pallas_linear(x, w_t, b2d):
    """y = x @ w_t + b;  x: (M, K), w_t: (K, N) pre-transposed, b2d: (1, N)."""
    m, kdim = x.shape
    n = w_t.shape[1]

    tn = n if n <= 512 else (_largest_divisor_tile(n, 512, 128) or n)
    tk = kdim if kdim <= 512 else (_largest_divisor_tile(kdim, 512, 128) or kdim)

    # M tiling (mem-bound GEMM -> prefer 512-row tiles); pad M if no aligned
    # divisor exists so a huge full-M block never blows VMEM (v7x: 64 MiB).
    if m <= 512:
        tm, mp = m, m
    else:
        tm = _largest_divisor_tile(m, 512, 8)
        if tm is None:
            tm = 512
            mp = ((m + tm - 1) // tm) * tm
            x = jnp.pad(x, ((0, mp - m), (0, 0)))
        else:
            mp = m

    nk = kdim // tk
    cost = pl.CostEstimate(
        flops=2 * mp * kdim * n,
        transcendentals=0,
        bytes_accessed=4 * (mp * kdim + kdim * n + mp * n + n),
    )

    if nk == 1:
        out = pl.pallas_call(
            _linear_kernel_1k,
            out_shape=jax.ShapeDtypeStruct((mp, n), jnp.float32),
            grid=(mp // tm, n // tn),
            in_specs=[
                pl.BlockSpec((tm, tk), lambda i, j: (i, 0)),
                pl.BlockSpec((tk, tn), lambda i, j: (0, j)),
                pl.BlockSpec((1, tn), lambda i, j: (0, j)),
            ],
            out_specs=pl.BlockSpec((tm, tn), lambda i, j: (i, j)),
            compiler_params=pltpu.CompilerParams(
                dimension_semantics=("parallel", "parallel")
            ),
            cost_estimate=cost,
        )(x, w_t, b2d)
    else:
        out = pl.pallas_call(
            _linear_kernel_acc,
            out_shape=jax.ShapeDtypeStruct((mp, n), jnp.float32),
            grid=(mp // tm, n // tn, nk),
            in_specs=[
                pl.BlockSpec((tm, tk), lambda i, j, kk: (i, kk)),
                pl.BlockSpec((tk, tn), lambda i, j, kk: (kk, j)),
                pl.BlockSpec((1, tn), lambda i, j, kk: (0, j)),
            ],
            out_specs=pl.BlockSpec((tm, tn), lambda i, j, kk: (i, j)),
            scratch_shapes=[pltpu.VMEM((tm, tn), jnp.float32)],
            compiler_params=pltpu.CompilerParams(
                dimension_semantics=("parallel", "parallel", "arbitrary")
            ),
            cost_estimate=cost,
        )(x, w_t, b2d)

    return out if mp == m else out[:m]


# ----------------------------------------------------------------------------
# Flash-style RoPE attention: grid = (B*H, q_blocks, kv_blocks).
# q/k arrive per head with channels in [re-half | im-half] order (the
# de-interleave permutation is folded into wq/wk at prep time); the 1/sqrt(Dh)
# scale is folded into wq.  cos_t/sin_t are sign-folded rotate-half tables.
# ----------------------------------------------------------------------------
def _flash_rope_kernel(q_ref, k_ref, v_ref, cq_ref, sq_ref, ck_ref, sk_ref,
                       o_ref, qrot_ref, m_ref, l_ref, acc_ref, *, half):
    kvi = pl.program_id(2)

    @pl.when(kvi == 0)
    def _():
        # rotate the q tile once per q block; keep it as bf16 for the MXU
        q = q_ref[0].astype(jnp.float32)                       # (tq, Dh)
        q_sw = jnp.concatenate([q[:, half:], q[:, :half]], axis=-1)
        qrot_ref[...] = (q * cq_ref[...] + q_sw * sq_ref[...]).astype(
            qrot_ref.dtype)
        m_ref[...] = jnp.full(m_ref.shape, -jnp.inf, dtype=m_ref.dtype)
        l_ref[...] = jnp.zeros(l_ref.shape, dtype=l_ref.dtype)
        acc_ref[...] = jnp.zeros(acc_ref.shape, dtype=acc_ref.dtype)

    # rotate the current kv tile (cheap VPU work, hidden under the MXU)
    k = k_ref[0].astype(jnp.float32)                           # (tkv, Dh)
    k_sw = jnp.concatenate([k[:, half:], k[:, :half]], axis=-1)
    kr = (k * ck_ref[...] + k_sw * sk_ref[...]).astype(jnp.bfloat16)

    # QK^T over the full head dim, bf16 operands, f32 accumulation
    s = jax.lax.dot_general(
        qrot_ref[...], kr, (((1,), (1,)), ((), ())),
        preferred_element_type=jnp.float32)                    # (tq, tkv)

    # online softmax update
    m_prev = m_ref[...]
    m_new = jnp.maximum(m_prev, jnp.max(s, axis=-1, keepdims=True))
    alpha = jnp.exp(m_prev - m_new)
    p = jnp.exp(s - m_new)
    l_ref[...] = alpha * l_ref[...] + jnp.sum(p, axis=-1, keepdims=True)
    acc_ref[...] = alpha * acc_ref[...] + jnp.dot(
        p.astype(jnp.bfloat16), v_ref[0], preferred_element_type=jnp.float32)
    m_ref[...] = m_new

    @pl.when(kvi == pl.num_programs(2) - 1)
    def _():
        # EUP approx reciprocal (~2^-12 rel err), folded into the final store
        o_ref[0] = (acc_ref[...] * pl.reciprocal(l_ref[...], approx=True)
                    ).astype(o_ref.dtype)


def _pick_seq_tile(s, preferred):
    if s <= preferred:
        return s
    return _largest_divisor_tile(s, preferred, 128) or s
    # TODO(synk): for very long S with no 128-aligned divisor this falls back
    # to a full-S tile; pad S (masked tail) to keep the tile bounded.


def pallas_flash_rope_attention(q, k, v, cos_t, sin_t):
    """q, k, v: (B*H, S, Dh) bf16; cos_t, sin_t: (S, Dh) f32 rotate-half tables."""
    bh, s, dh = q.shape
    half = dh // 2
    tq = _pick_seq_tile(s, 256)
    tkv = _pick_seq_tile(s, 512)
    nq, nkv = s // tq, s // tkv

    qkv_q_spec = pl.BlockSpec((1, tq, dh), lambda b, qi, ki: (b, qi, 0))
    qkv_k_spec = pl.BlockSpec((1, tkv, dh), lambda b, qi, ki: (b, ki, 0))
    tbl_q_spec = pl.BlockSpec((tq, dh), lambda b, qi, ki: (qi, 0))
    tbl_k_spec = pl.BlockSpec((tkv, dh), lambda b, qi, ki: (ki, 0))

    # VMEM budget: double-buffered tiles + scratch + score temporaries
    est = (2 * tq * dh * 2 + 2 * 2 * tkv * dh * 2
           + 2 * 2 * tq * dh * 4 + 2 * 2 * tkv * dh * 4
           + 2 * tq * dh * 4
           + tq * dh * 2 + 2 * tq * 4 + tq * dh * 4
           + 4 * tq * tkv * 4)
    vmem_limit = int(min(max(2 * est, 16 << 20), 48 << 20))

    cost = pl.CostEstimate(
        flops=int(bh * (4 * s * s * dh + 12 * s * dh)),
        transcendentals=int(bh * s * s),
        bytes_accessed=int(2 * 3 * bh * s * dh + 4 * bh * s * dh + 8 * s * dh),
    )

    kernel = functools.partial(_flash_rope_kernel, half=half)
    return pl.pallas_call(
        kernel,
        out_shape=jax.ShapeDtypeStruct((bh, s, dh), jnp.float32),
        grid=(bh, nq, nkv),
        in_specs=[qkv_q_spec, qkv_k_spec, qkv_k_spec,
                  tbl_q_spec, tbl_q_spec, tbl_k_spec, tbl_k_spec],
        out_specs=pl.BlockSpec((1, tq, dh), lambda b, qi, ki: (b, qi, 0)),
        scratch_shapes=[
            pltpu.VMEM((tq, dh), jnp.bfloat16),   # rotated q tile
            pltpu.VMEM((tq, 1), jnp.float32),     # running max
            pltpu.VMEM((tq, 1), jnp.float32),     # running denom
            pltpu.VMEM((tq, dh), jnp.float32),    # running PV accumulator
        ],
        compiler_params=pltpu.CompilerParams(
            dimension_semantics=("parallel", "parallel", "arbitrary"),
            vmem_limit_bytes=vmem_limit,
        ),
        cost_estimate=cost,
    )(q, k, v, cos_t, sin_t, cos_t, sin_t)


# ----------------------------------------------------------------------------
# RoPE frequency tables (compute_axial_cis) as real rotate-half tables
# ----------------------------------------------------------------------------
def compute_axial_cos_sin(dim, q_len, theta=10000.0):
    end_x = int(math.floor(math.sqrt(q_len)))
    t = jnp.arange(end_x * int(math.ceil(q_len / end_x)), dtype=jnp.float32)[:q_len]
    t_x = t % end_x
    t_y = jnp.floor(t / end_x)
    freqs = 1.0 / theta ** (
        jnp.arange(0, dim, 4, dtype=jnp.float32)[: dim // 4] / dim
    )
    ang = jnp.concatenate([jnp.outer(t_x, freqs), jnp.outer(t_y, freqs)], axis=-1)
    return jnp.cos(ang), jnp.sin(ang)  # each (q_len, dim // 2)


def compute_rope_tables(dim, q_len, theta=10000.0):
    """Sign-folded rotate-half tables for the [re-half | im-half] layout."""
    cos, sin = compute_axial_cos_sin(dim, q_len, theta)
    cos_t = jnp.concatenate([cos, cos], axis=-1)   # (S, dim)
    sin_t = jnp.concatenate([-sin, sin], axis=-1)  # (S, dim)
    return cos_t, sin_t


# ----------------------------------------------------------------------------
# Parameter init (PyTorch nn.Linear semantics) and one-time kernel-layout prep
# ----------------------------------------------------------------------------
def init_params(key, embedding_dim, internal_dim, kv_in_dim):
    keys = jax.random.split(key, 8)

    def lin(kw, kb, din, dout):
        bound = 1.0 / math.sqrt(din)
        w = jax.random.uniform(kw, (dout, din), jnp.float32, -bound, bound)
        b = jax.random.uniform(kb, (dout,), jnp.float32, -bound, bound)
        return w, b

    wq, bq = lin(keys[0], keys[1], embedding_dim, internal_dim)
    wk, bk = lin(keys[2], keys[3], kv_in_dim, internal_dim)
    wv, bv = lin(keys[4], keys[5], kv_in_dim, internal_dim)
    wo, bo = lin(keys[6], keys[7], internal_dim, embedding_dim)
    return dict(wq=wq, bq=bq, wk=wk, bk=bk, wv=wv, bv=bv, wo=wo, bo=bo)


def _deinterleave_perm(c, num_heads):
    dh = c // num_heads
    idx = jnp.arange(c).reshape(num_heads, dh)
    return jnp.concatenate([idx[:, 0::2], idx[:, 1::2]], axis=1).reshape(-1)


def prepare_params(params, num_heads):
    """One-time layout prep: transpose weights, fold the per-head RoPE
    de-interleave permutation into wq/wk/bq/bk columns, and fold the
    1/sqrt(head_dim) attention scale into wq/bq."""
    c = params["wq"].shape[0]
    dh = c // num_heads
    scale = 1.0 / math.sqrt(dh)
    perm = _deinterleave_perm(c, num_heads)
    return dict(
        wq_t=(params["wq"].T * scale)[:, perm],
        bq=(params["bq"] * scale)[perm].reshape(1, -1),
        wk_t=params["wk"].T[:, perm], bk=params["bk"][perm].reshape(1, -1),
        wv_t=params["wv"].T, bv=params["bv"].reshape(1, -1),
        wo_t=params["wo"].T, bo=params["bo"].reshape(1, -1),
    )


# ----------------------------------------------------------------------------
# Forward
# ----------------------------------------------------------------------------
def rope_attention_forward(prepared, q, k, v, *, num_heads, rope_theta=10000.0):
    b, c_in, s = q.shape
    internal_dim = prepared["wq_t"].shape[1]
    dh = internal_dim // num_heads

    # raw row-major reshape, exactly as in the PyTorch module
    q2 = q.reshape(b * s, -1)
    k2 = k.reshape(b * s, -1)
    v2 = v.reshape(b * s, -1)

    qp = pallas_linear(q2, prepared["wq_t"], prepared["bq"])  # scaled + deinterleaved
    kp = pallas_linear(k2, prepared["wk_t"], prepared["bk"])  # deinterleaved
    vp = pallas_linear(v2, prepared["wv_t"], prepared["bv"])  # natural layout

    # head-major (B*H, S, Dh) bf16 slabs for the flash kernel
    def to_heads(x):
        return (x.astype(jnp.bfloat16)
                .reshape(b, s, num_heads, dh)
                .transpose((0, 2, 1, 3))
                .reshape(b * num_heads, s, dh))

    cos_t, sin_t = compute_rope_tables(dh, s, rope_theta)

    attn = pallas_flash_rope_attention(
        to_heads(qp), to_heads(kp), to_heads(vp), cos_t, sin_t)  # (B*H, S, Dh) f32

    out = (attn.reshape(b, num_heads, s, dh)
           .transpose((0, 2, 1, 3))
           .reshape(b * s, internal_dim))
    out = pallas_linear(out, prepared["wo_t"], prepared["bo"])
    return out.reshape(b, s, -1)


# ----------------------------------------------------------------------------
# Pure-JAX reference (mirrors the PyTorch code, interleaved RoPE pairs)
# ----------------------------------------------------------------------------
def rope_attention_reference(params, q, k, v, *, num_heads, rope_theta=10000.0):
    b, c, s = q.shape
    internal_dim = params["wq"].shape[0]
    dh = internal_dim // num_heads
    hp = jax.lax.Precision.HIGHEST

    def lin(x, w, bb):
        return jnp.dot(x, w.T, precision=hp) + bb

    qp = lin(q.reshape(b * s, -1), params["wq"], params["bq"]).reshape(b, s, -1)
    kp = lin(k.reshape(b * s, -1), params["wk"], params["bk"]).reshape(b, s, -1)
    vp = lin(v.reshape(b * s, -1), params["wv"], params["bv"]).reshape(b, s, -1)

    def sep(x):
        return x.reshape(b, s, num_heads, dh).transpose(0, 2, 1, 3)

    qh, kh, vh = sep(qp), sep(kp), sep(vp)
    cos, sin = compute_axial_cos_sin(dh, s, rope_theta)

    def rope(x):
        xe, xo = x[..., 0::2], x[..., 1::2]
        re = xe * cos - xo * sin
        im = xe * sin + xo * cos
        return jnp.stack([re, im], axis=-1).reshape(x.shape)

    qr, kr = rope(qh), rope(kh)
    scores = jnp.einsum("bhqd,bhkd->bhqk", qr, kr, precision=hp) / math.sqrt(dh)
    attn = jax.nn.softmax(scores, axis=-1)
    out = jnp.einsum("bhqk,bhkd->bhqd", attn, vh, precision=hp)
    out = out.transpose(0, 2, 1, 3).reshape(b, s, internal_dim)
    return lin(out, params["wo"], params["bo"])


# ----------------------------------------------------------------------------
if __name__ == "__main__":
    B, EMB, S = 2, 32, 16          # (batch, channels=embedding_dim, seq_len)
    NUM_HEADS = 4
    INTERNAL_DIM = EMB             # downsample_rate = 1

    key = jax.random.PRNGKey(0)
    kq, kk, kv, kp = jax.random.split(key, 4)
    q = jax.random.normal(kq, (B, EMB, S), jnp.float32)
    k = jax.random.normal(kk, (B, EMB, S), jnp.float32)
    v = jax.random.normal(kv, (B, EMB, S), jnp.float32)

    params = init_params(kp, EMB, INTERNAL_DIM, EMB)
    prepared = prepare_params(params, NUM_HEADS)

    out = rope_attention_forward(prepared, q, k, v, num_heads=NUM_HEADS)
    out = jax.block_until_ready(out)

    ref = rope_attention_reference(params, q, k, v, num_heads=NUM_HEADS)
    ref = jax.block_until_ready(ref)

    assert out.shape == (B, S, EMB), out.shape
    # Tolerance covers bf16 MXU operands + approx EUP reciprocal in the kernel
    # vs the Precision.HIGHEST pure-f32 reference.
    err = float(jnp.max(jnp.abs(out - ref)))
    assert jnp.allclose(out, ref, atol=2e-2, rtol=2e-2), err
    print("KERNEL_OK")
</pallas_src>

<mosaic_0001>
module attributes {stable_mosaic.version = 11 : i64} {
  func.func @_linear_kernel_1k(%arg0: i32, %arg1: i32, %arg2: memref<32x32xf32, #tpu.memory_space<vmem>>, %arg3: memref<32x32xf32, #tpu.memory_space<vmem>>, %arg4: memref<1x32xf32, #tpu.memory_space<vmem>>, %arg5: memref<32x32xf32, #tpu.memory_space<vmem>>) attributes {dimension_semantics = [#tpu.dimension_semantics<parallel>, #tpu.dimension_semantics<parallel>], iteration_bounds = array<i64: 1, 1>, scalar_prefetch = 0 : i64, scratch_operands = 0 : i64, tpu.core_type = #tpu.core_type<tc>, window_params = [{transform_indices = @transform_0, window_bounds = array<i64: 32, 32>}, {transform_indices = @transform_1, window_bounds = array<i64: 32, 32>}, {transform_indices = @transform_2, window_bounds = array<i64: 1, 32>}, {transform_indices = @transform_3, window_bounds = array<i64: 32, 32>}]} {
    %c0 = arith.constant 0 : index
    %c0_0 = arith.constant 0 : index
    %0 = vector.load %arg2[%c0, %c0_0] : memref<32x32xf32, #tpu.memory_space<vmem>>, vector<32x32xf32>
    %c0_1 = arith.constant 0 : index
    %c0_2 = arith.constant 0 : index
    %1 = vector.load %arg3[%c0_1, %c0_2] : memref<32x32xf32, #tpu.memory_space<vmem>>, vector<32x32xf32>
    %cst = arith.constant dense<0.000000e+00> : vector<32x32xf32>
    %2 = tpu.matmul %0, %1, %cst {dimension_numbers = #tpu.dot_dimension_numbers<[1], [0], [0], [1], [0, 0, 1, 1], [], []>} : vector<32x32xf32>, vector<32x32xf32>, vector<32x32xf32> -> vector<32x32xf32>
    %c0_3 = arith.constant 0 : index
    %c0_4 = arith.constant 0 : index
    %3 = vector.load %arg4[%c0_3, %c0_4] : memref<1x32xf32, #tpu.memory_space<vmem>>, vector<1x32xf32>
    %4 = vector.broadcast %3 : vector<1x32xf32> to vector<32x32xf32>
    %5 = arith.addf %2, %4 : vector<32x32xf32>
    %c0_5 = arith.constant 0 : index
    %c0_6 = arith.constant 0 : index
    %6 = vector.load %arg5[%c0_5, %c0_6] : memref<32x32xf32, #tpu.memory_space<vmem>>, vector<32x32xf32>
    tpu.vector_store %arg5[%c0_5, %c0_6], %5 {strides = array<i32>} : memref<32x32xf32, #tpu.memory_space<vmem>>, vector<32x32xf32>,
    return
  }
  func.func @transform_0(%arg0: i32, %arg1: i32) -> (i32, i32) {
    %c0_i32 = arith.constant 0 : i32
    %c0_i32_0 = arith.constant 0 : i32
    return %arg0, %c0_i32 : i32, i32
  }
  func.func @transform_1(%arg0: i32, %arg1: i32) -> (i32, i32) {
    %c0_i32 = arith.constant 0 : i32
    %c0_i32_0 = arith.constant 0 : i32
    return %c0_i32, %arg1 : i32, i32
  }
  func.func @transform_2(%arg0: i32, %arg1: i32) -> (i32, i32) {
    %c0_i32 = arith.constant 0 : i32
    %c0_i32_0 = arith.constant 0 : i32
    return %c0_i32, %arg1 : i32, i32
  }
  func.func @transform_3(%arg0: i32, %arg1: i32) -> (i32, i32) {
    %c0_i32 = arith.constant 0 : i32
    return %arg0, %arg1 : i32, i32
  }
}

</mosaic_0001>

<bundles_post_ra>
// kernel: tpu_custom_call.1
= control target key start
LH: loop header
LB: loop body
LE: loop exit
PB: predicated region body
PF: predicated region fallthrough
CT: control target
= control target key end

     0   :  { %8 = vsyncpa [#allocation3], 0  ;;  %s375_s0 = inlined_call_operand.hbm [shape: f32[32,32], index: 0, kind: input, shape index: {}]   ;;  %s376_s1 = inlined_call_operand.hbm [shape: f32[32,32], index: 1, kind: input, shape index: {}]   ;;  %s377_s2 = inlined_call_operand.vmem [shape: f32[1,32], index: 2, kind: input, shape index: {}]   ;;  %s378_s3 = inlined_call_operand.hbm [shape: f32[32,32], index: 3, kind: output, shape index: {}]  }
   0x1   :  { %9 = vsyncpa [#allocation6], 0 }
   0x2   :  { %10 = vsyncpa [#allocation4], 0  ;;  %s294_s12 = smov [#allocation2]   ;;  %s222_s16 = scalar_lea.hbm %s375_s0, 512 }
   0x3   :  { %s16_s13 = sshll.u32 %s294_s12, 4  ;;  %p223_p0 = scmp.ne.s32.totalorder %s375_s0, %s222_s16  ;;  %s17_s13 = int_to_ptr.vmem [resolvable:$true] %s16_s13 }
   0x4   :  { %p226_p1 = scmp.lt.u32.totalorder %s222_s16, %s375_s0 }
   0x6   :  { %p228_p2 = pnand %p226_p1, %p223_p0 }
   0x8   :  { %231 = shalt.err (!%p228_p2)
}
   0x9   :  { %s232_s21 = scalar_lea.vmem %s17_s13, 512  ;;  %p237_p4 = scmp.lt.s32.totalorder %s17_s13, %s17_s13 }
   0xa   :  { %p233_p3 = scmp.ne.s32.totalorder %s17_s13, %s232_s21  ;;  %p238_p5 = scmp.lt.s32.totalorder %s232_s21, %s232_s21 }
   0xc   :  { %p239_p6 = por %p238_p5, %p237_p4 }
   0xe   :  { %p240_p7 = pnand %p239_p6, %p233_p3 }
  0x10   :  { %243 = shalt.err (!%p240_p7)
}
  0x11   :  { %s295_s22 = smov 128   ;;  %s296_s23 = smov 8  }
  0x12   :  { %22 = dma.hbm_to_vmem [thread:$0]  %s375_s0, 512, %s17_s13, [#allocation3], %s295_s22, %s295_s22, %s296_s23  }
  0x13   :  { %s297_s26 = smov [#allocation5]   ;;  %s244_s30 = scalar_lea.hbm %s376_s1, 512 }
  0x14   :  { %s28_s27 = sshll.u32 %s297_s26, 4  ;;  %p245_p8 = scmp.ne.s32.totalorder %s376_s1, %s244_s30  ;;  %s29_s27 = int_to_ptr.vmem [resolvable:$true] %s28_s27 }
  0x15   :  { %p248_p9 = scmp.lt.u32.totalorder %s244_s30, %s376_s1 }
  0x17   :  { %p250_p10 = pnand %p248_p9, %p245_p8 }
  0x19   :  { %253 = shalt.err (!%p250_p10)
}
  0x1a   :  { %s254_s8 = scalar_lea.vmem %s29_s27, 512  ;;  %p259_p12 = scmp.lt.s32.totalorder %s29_s27, %s29_s27 }
  0x1b   :  { %p255_p11 = scmp.ne.s32.totalorder %s29_s27, %s254_s8  ;;  %p260_p13 = scmp.lt.s32.totalorder %s254_s8, %s254_s8 }
  0x1d   :  { %p261_p0 = por %p260_p13, %p259_p12 }
  0x1f   :  { %p262_p1 = pnand %p261_p0, %p255_p11 }
  0x21   :  { %265 = shalt.err (!%p262_p1)
}
  0x22   :  { %34 = dma.hbm_to_vmem [thread:$0]  %s376_s1, 512, %s29_s27, [#allocation6], %s295_s22, %s295_s22, %s296_s23  }
  0x23   :  { %288 = dma.done.wait [#allocation3], 512  }
  0x24   :  { %289 = vsyncadd [#allocation3], 4294966784 }
  0x25   :  { %290 = dma.done.wait [#allocation6], 512  }
  0x26   :  { %291 = vsyncadd [#allocation6], 4294966784  ;;  %vm58_vm0 = vcmask 261120   ;;  %v47_v0 = vld [vmem:[#allocation5] sm:$0xff]  ;;  %v48_v1 = vld [vmem:[#allocation5 + $0x8] sm:$0xff]  ;;  %s298_s11 = smov [#allocation7]  }
  0x27   :  { %v49_v2 = vld [vmem:[#allocation5 + $0x10] sm:$0xff]  ;;  %v205_v3 = vpack.c.bf16 %v48_v1, %v47_v0  ;;  %v50_v4 = vld [vmem:[#allocation5 + $0x18] sm:$0xff]  ;;  %v43_v5 = vld [vmem:[#allocation2] sm:$0xff]  ;;  %s165_s12 = sshll.u32 %s298_s11, 4  ;;  %s166_s12 = int_to_ptr.vmem [resolvable:$true] %s165_s12 }
  0x28   :  { %v45_v6 = vld [vmem:[#allocation2 + $0x10] sm:$0xff]  ;;  %v209_v7 = vpack.c.bf16 %v50_v4, %v49_v2  ;;  %199 = vmatprep.mubr.msk.f32.mxu0 %vm58_vm0, %v43_v5  ;;  %v44_v8 = vld [vmem:[#allocation2 + $0x8] sm:$0xff]  ;;  %v46_v9 = vld [vmem:[#allocation2 + $0x18] sm:$0xff]  ;;  %p271_p3 = scmp.lt.s32.totalorder %s166_s12, %s166_s12 }
  0x29   :  { %202 = vmatprep.mubr.msk.f32.mxu1 %vm58_vm0, %v45_v6  ;;  %206 = vmatprep.subr.bf16.mxu0 %v205_v3  ;;  %v178_v10 = vld [vmem:[%s377_s2] ss:$0 sm:$0xff]  ;;  %s266_s2 = scalar_lea.vmem %s166_s12, 512 }
  0x2a   :  { %213 = vmatprep.subr.bf16.mxu1 %v205_v3  ;;  %208 = vmatpush3.bf16.msra.mxu0 %v205_v3  ;;  %p267_p2 = scmp.ne.s32.totalorder %s166_s12, %s266_s2  ;;  %p272_p4 = scmp.lt.s32.totalorder %s266_s2, %s266_s2 }
  0x2b   :  { %215 = vmatpush3.bf16.msra.mxu1 %v205_v3  ;;  %210 = vmatprep.subr.bf16.mxu0 %v209_v7 }
  0x2c   :  { %214 = vmatprep.subr.bf16.mxu1 %v209_v7  ;;  %p273_p5 = por %p272_p4, %p271_p3 }
  0x2e   :  { %212 = vmatpush3.bf16.msra.mxu0 %v209_v7  ;;  %p274_p6 = pnand %p273_p5, %p267_p2 }
  0x2f   :  { %216 = vmatpush3.bf16.msra.mxu1 %v209_v7 }
  0x31   :  { %200 = vmatmul.mubr.msk.f32.vlgmr.msra.gmra.mrb[0].mxu0 %vm58_vm0, %v44_v8 }
  0x32   :  { %203 = vmatmul.mubr.msk.f32.vlgmr.msra.gmra.mrb[0].mxu1 %vm58_vm0, %v46_v9 }
 0x104   :  { %v201_v11 = vpop.f32.mrb[0].mxu0 }
 0x105   :  { %v204_v12 = vpop.f32.mrb[0].mxu1  ;;  %v143_v13 = vadd.f32 %v201_v11, %v178_v10  ;;  %v137_v15 = vpop.f32.mrb[1].mxu0 }
 0x106   :  { %v153_v14 = vadd.f32 %v204_v12, %v178_v10  ;;  %v147_v16 = vpop.f32.mrb[1].mxu1  ;;  %v138_v17 = vadd.f32 %v178_v10, %v137_v15 }
 0x107   :  { %v148_v18 = vadd.f32 %v178_v10, %v147_v16  ;;  %157 = vst.msk [vmem:[#allocation7 + $0x8] sm:$0xff] %vm58_vm0, %v143_v13 }
 0x108   :  { %159 = vst.msk [vmem:[#allocation7 + $0x18] sm:$0xff] %vm58_vm0, %v153_v14  ;;  %156 = vst.msk [vmem:[#allocation7] sm:$0xff] %vm58_vm0, %v138_v17 }
 0x109   :  { %158 = vst.msk [vmem:[#allocation7 + $0x10] sm:$0xff] %vm58_vm0, %v148_v18 }
 0x10a   :  { %277 = shalt.err (!%p274_p6)
}
 0x10b   :  { %s278_s15 = scalar_lea.hbm %s378_s3, 512 }
 0x10c   :  { %p279_p7 = scmp.ne.s32.totalorder %s378_s3, %s278_s15  ;;  %p282_p8 = scmp.lt.u32.totalorder %s278_s15, %s378_s3 }
 0x10e   :  { %p284_p9 = pnand %p282_p8, %p279_p7 }
 0x110   :  { %287 = shalt.err (!%p284_p9)
}
 0x111   :  { %171 = dma.vmem_to_hbm [thread:$0]  %s166_s12, 512, %s378_s3, [#allocation4], %s295_s22, %s295_s22, %s296_s23  }
 0x112   :  { %292 = dma.done.wait [#allocation4], 512  }
 0x113   :  { %293 = vsyncadd [#allocation4], 4294966784 }
 0x114   :  { %175 = vsyncpa [#allocation3], 1 }
 0x115   :  { %176 = vsyncpa [#allocation6], 1 }
 0x116   :  { %177 = vsyncpa [#allocation4], 1 }

</bundles_post_ra>
